<compile_context>
chip_gen: v5e
topology: v5e:2x2
jax: 0.10.0
libtpu: 0.0.40
codegen_flags: <defaults>
</compile_context>

<pallas_src>
import functools

import jax
import jax.numpy as jnp
from jax.experimental import pallas as pl
from jax.experimental.pallas import tpu as pltpu


def _round_up(x, m):
    return ((x + m - 1) // m) * m


def _linreg_sse_kernel(x_ref, w_ref, b_ref, t_ref, yhat_ref, sse_ref, *, tb, b_true):
    # x: (TB, F) features tile, w: (1, F), b: (1, 1), t: (TB, 1) target tile.
    x = x_ref[...].astype(jnp.float32)
    w = w_ref[...].astype(jnp.float32)            # broadcast over rows
    b = b_ref[0, 0].astype(jnp.float32)

    # Linear layer as VPU multiply + lane reduction (MXU would be ~1/256 utilized).
    y = jnp.sum(x * w, axis=-1, keepdims=True) + b        # (TB, 1)
    yhat_ref[...] = y.astype(yhat_ref.dtype)
    # TODO(synk): if F is tiny and B is huge, a lane-dense (TB/128,128) y_hat slab
    # would avoid the 1-lane masked stores; secondary since loads dominate by ~F x.

    # Per-tile partial sum of squared errors; mask padded rows of the last tile.
    diff = y - t_ref[...].astype(jnp.float32)
    row = pl.program_id(0) * tb + jax.lax.broadcasted_iota(jnp.int32, (tb, 1), 0)
    sq = jnp.where(row < b_true, diff * diff, 0.0)
    sse_ref[0, 0] = jnp.sum(sq)                            # scalar -> SMEM output


def main_model_forward(features, target, weight, bias, *, tb=None):
    """features: (B, F), target: (B,), weight: (1, F), bias: (1, 1)."""
    B, F = features.shape
    itemsize = jnp.dtype(features.dtype).itemsize

    if tb is None:
        # Biggest tile whose features buffer stays <= ~2 MiB (double-buffered this is
        # well inside every generation's VMEM budget), capped for sane compile sizes.
        max_rows = max(8, (2 * 1024 * 1024) // max(1, F * itemsize))
        tb = min(_round_up(B, 8), (max_rows // 8) * 8, 1024)
    tb = max(8, (tb // 8) * 8)

    num_tiles = pl.cdiv(B, tb)
    b_pad = num_tiles * tb

    if b_pad != B:
        features = jnp.pad(features, ((0, b_pad - B), (0, 0)))
        target = jnp.pad(target, (0, b_pad - B))
    target2d = target.reshape(b_pad, 1)

    kernel = functools.partial(_linreg_sse_kernel, tb=tb, b_true=B)

    yhat2d, sse = pl.pallas_call(
        kernel,
        grid=(num_tiles,),
        out_shape=(
            jax.ShapeDtypeStruct((b_pad, 1), jnp.float32),
            jax.ShapeDtypeStruct((num_tiles, 1), jnp.float32),
        ),
        in_specs=[
            pl.BlockSpec((tb, F), lambda i: (i, 0)),   # features tile
            pl.BlockSpec((1, F), lambda i: (0, 0)),    # weight (resident)
            pl.BlockSpec((1, 1), lambda i: (0, 0)),    # bias   (resident)
            pl.BlockSpec((tb, 1), lambda i: (i, 0)),   # target tile
        ],
        out_specs=(
            pl.BlockSpec((tb, 1), lambda i: (i, 0)),   # y_hat tile
            pl.BlockSpec((1, 1), lambda i: (i, 0),     # per-tile partial SSE (scalar)
                         memory_space=pltpu.MemorySpace.SMEM),
        ),
        compiler_params=pltpu.CompilerParams(
            dimension_semantics=("parallel",),         # batch tiles are independent
        ),
    )(features, weight, bias, target2d)

    y_hat = yhat2d[:B, 0]                              # torch.squeeze(y_hat, 1)
    loss = jnp.sqrt(jnp.sum(sse) / B)                  # RMSE finalize (true B)
    return loss, y_hat


if __name__ == "__main__":
    def reference(features, target, weight, bias):
        y = jnp.sum(features * weight, axis=-1) + bias[0, 0]
        return jnp.sqrt(jnp.mean((y - target) ** 2)), y

    # ---- Small shape matching the module's shipped problem size --------------
    B, F = 8, 32
    key = jax.random.PRNGKey(0)
    k_x, k_t, k_w, k_b = jax.random.split(key, 4)

    features = jax.random.normal(k_x, (B, F), dtype=jnp.float32)
    target = jax.random.normal(k_t, (B,), dtype=jnp.float32)
    bound = 1.0 / jnp.sqrt(jnp.float32(F))
    weight = jax.random.uniform(k_w, (1, F), jnp.float32, -bound, bound)
    bias = jax.random.uniform(k_b, (1, 1), jnp.float32, -bound, bound)

    loss, y_hat = main_model_forward(features, target, weight, bias)
    loss = jax.block_until_ready(loss)
    y_hat = jax.block_until_ready(y_hat)

    loss_ref, y_ref = reference(features, target, weight, bias)
    assert jnp.allclose(y_hat, y_ref, atol=1e-5), "y_hat mismatch (small)"
    assert jnp.allclose(loss, loss_ref, atol=1e-5), "loss mismatch (small)"

    # ---- Larger, non-multiple batch: exercises B-tiling + remainder masking --
    B2 = 300
    k_x2, k_t2 = jax.random.split(jax.random.PRNGKey(1), 2)
    features2 = jax.random.normal(k_x2, (B2, F), dtype=jnp.float32)
    target2 = jax.random.normal(k_t2, (B2,), dtype=jnp.float32)

    loss2, y_hat2 = main_model_forward(features2, target2, weight, bias, tb=64)
    loss2 = jax.block_until_ready(loss2)
    y_hat2 = jax.block_until_ready(y_hat2)

    loss2_ref, y2_ref = reference(features2, target2, weight, bias)
    assert jnp.allclose(y_hat2, y2_ref, atol=1e-5), "y_hat mismatch (tiled)"
    assert jnp.allclose(loss2, loss2_ref, atol=1e-4), "loss mismatch (tiled)"

    print("KERNEL_OK")
</pallas_src>

<mosaic_0001>
module attributes {stable_mosaic.version = 11 : i64} {
  func.func @_linreg_sse_kernel(%arg0: i32, %arg1: memref<8x32xf32, #tpu.memory_space<vmem>>, %arg2: memref<1x32xf32, #tpu.memory_space<vmem>>, %arg3: memref<1x1xf32, #tpu.memory_space<vmem>>, %arg4: memref<8x1xf32, #tpu.memory_space<vmem>>, %arg5: memref<8x1xf32, #tpu.memory_space<vmem>>, %arg6: memref<1x1xf32, #tpu.memory_space<smem>>) attributes {dimension_semantics = [#tpu.dimension_semantics<parallel>], iteration_bounds = array<i64: 1>, scalar_prefetch = 0 : i64, scratch_operands = 0 : i64, tpu.core_type = #tpu.core_type<tc>, window_params = [{transform_indices = @transform_0, window_bounds = array<i64: 8, 32>}, {pipeline_mode = #tpu.pipeline_mode<synchronous>, transform_indices = @transform_1, window_bounds = array<i64: 1, 32>}, {pipeline_mode = #tpu.pipeline_mode<synchronous>, transform_indices = @transform_2, window_bounds = array<i64: 1, 1>}, {transform_indices = @transform_3, window_bounds = array<i64: 8, 1>}, {transform_indices = @transform_4, window_bounds = array<i64: 8, 1>}, {transform_indices = @transform_5, window_bounds = array<i64: 1, 1>}]} {
    %c0 = arith.constant 0 : index
    %c0_0 = arith.constant 0 : index
    %0 = vector.load %arg1[%c0, %c0_0] : memref<8x32xf32, #tpu.memory_space<vmem>>, vector<8x32xf32>
    %c0_1 = arith.constant 0 : index
    %c0_2 = arith.constant 0 : index
    %1 = vector.load %arg2[%c0_1, %c0_2] : memref<1x32xf32, #tpu.memory_space<vmem>>, vector<1x32xf32>
    %c0_3 = arith.constant 0 : index
    %c0_4 = arith.constant 0 : index
    %2 = vector.load %arg3[%c0_3, %c0_4] : memref<1x1xf32, #tpu.memory_space<vmem>>, vector<1x1xf32>
    %3 = vector.extract %2[0, 0] : f32 from vector<1x1xf32>
    %4 = vector.broadcast %1 : vector<1x32xf32> to vector<8x32xf32>
    %5 = arith.mulf %0, %4 : vector<8x32xf32>
    %cst = arith.constant dense<0.000000e+00> : vector<8xf32>
    %6 = vector.multi_reduction <add>, %5, %cst [1] : vector<8x32xf32> to vector<8xf32>
    %7 = vector.shape_cast %6 : vector<8xf32> to vector<8x1xf32>
    %8 = vector.broadcast %3 : f32 to vector<8x1xf32>
    %9 = arith.addf %7, %8 : vector<8x1xf32>
    %c0_5 = arith.constant 0 : index
    %c0_6 = arith.constant 0 : index
    %10 = vector.load %arg5[%c0_5, %c0_6] : memref<8x1xf32, #tpu.memory_space<vmem>>, vector<8x1xf32>
    tpu.vector_store %arg5[%c0_5, %c0_6], %9 {strides = array<i32>} : memref<8x1xf32, #tpu.memory_space<vmem>>, vector<8x1xf32>,
    %c0_7 = arith.constant 0 : index
    %c0_8 = arith.constant 0 : index
    %11 = vector.load %arg4[%c0_7, %c0_8] : memref<8x1xf32, #tpu.memory_space<vmem>>, vector<8x1xf32>
    %12 = arith.subf %9, %11 : vector<8x1xf32>
    %c8_i32 = arith.constant 8 : i32
    %13 = arith.muli %arg0, %c8_i32 : i32
    %14 = tpu.iota {dimensions = array<i32: 0>} : vector<8x1xi32>
    %15 = vector.broadcast %13 : i32 to vector<8x1xi32>
    %16 = arith.addi %15, %14 : vector<8x1xi32>
    %c8_i32_9 = arith.constant 8 : i32
    %17 = vector.broadcast %c8_i32_9 : i32 to vector<8x1xi32>
    %18 = arith.cmpi slt, %16, %17 : vector<8x1xi32>
    %19 = arith.mulf %12, %12 : vector<8x1xf32>
    %cst_10 = arith.constant 0.000000e+00 : f32
    %20 = vector.broadcast %cst_10 : f32 to vector<8x1xf32>
    %21 = arith.select %18, %19, %20 : vector<8x1xi1>, vector<8x1xf32>
    %22 = vector.shape_cast %21 : vector<8x1xf32> to vector<1x8x1xf32>
    %cst_11 = arith.constant dense<0.000000e+00> : vector<1xf32>
    %23 = vector.multi_reduction <add>, %22, %cst_11 [1, 2] : vector<1x8x1xf32> to vector<1xf32>
    %24 = vector.shape_cast %23 : vector<1xf32> to vector<1x1x1xf32>
    %25 = vector.extract %24[0, 0, 0] : f32 from vector<1x1x1xf32>
    %c0_12 = arith.constant 0 : index
    %c0_13 = arith.constant 0 : index
    %26 = memref.load %arg6[%c0_12, %c0_13] : memref<1x1xf32, #tpu.memory_space<smem>>
    memref.store %25, %arg6[%c0_12, %c0_13] : memref<1x1xf32, #tpu.memory_space<smem>>
    return
  }
  func.func @transform_0(%arg0: i32) -> (i32, i32) {
    %c0_i32 = arith.constant 0 : i32
    %c0_i32_0 = arith.constant 0 : i32
    return %arg0, %c0_i32 : i32, i32
  }
  func.func @transform_1(%arg0: i32) -> (i32, i32) {
    %c0_i32 = arith.constant 0 : i32
    %c0_i32_0 = arith.constant 0 : i32
    %c0_i32_1 = arith.constant 0 : i32
    return %c0_i32, %c0_i32_0 : i32, i32
  }
  func.func @transform_2(%arg0: i32) -> (i32, i32) {
    %c0_i32 = arith.constant 0 : i32
    %c0_i32_0 = arith.constant 0 : i32
    %c0_i32_1 = arith.constant 0 : i32
    return %c0_i32, %c0_i32_0 : i32, i32
  }
  func.func @transform_3(%arg0: i32) -> (i32, i32) {
    %c0_i32 = arith.constant 0 : i32
    %c0_i32_0 = arith.constant 0 : i32
    return %arg0, %c0_i32 : i32, i32
  }
  func.func @transform_4(%arg0: i32) -> (i32, i32) {
    %c0_i32 = arith.constant 0 : i32
    %c0_i32_0 = arith.constant 0 : i32
    return %arg0, %c0_i32 : i32, i32
  }
  func.func @transform_5(%arg0: i32) -> (i32, i32) {
    %c0_i32 = arith.constant 0 : i32
    %c0_i32_0 = arith.constant 0 : i32
    return %arg0, %c0_i32 : i32, i32
  }
}

</mosaic_0001>

<bundles_post_ra>
// kernel: tpu_custom_call.1
= control target key start
LH: loop header
LB: loop body
LE: loop exit
PB: predicated region body
PF: predicated region fallthrough
CT: control target
= control target key end

     0   :  { %s148_s0 = inlined_call_operand.vmem [shape: f32[8,32], index: 0, kind: input, shape index: {}]   ;;  %s149_s1 = inlined_call_operand.vmem [shape: f32[1,32], index: 1, kind: input, shape index: {}]   ;;  %s150_s2 = inlined_call_operand.<no memory space> [shape: f32[1,1], index: 2, kind: input, shape index: {}]   ;;  %s151_s3 = inlined_call_operand.vmem [shape: f32[8,1], index: 3, kind: input, shape index: {}]   ;;  %s152_s4 = inlined_call_operand.vmem [shape: f32[8,1], index: 4, kind: output, shape index: {0}]   ;;  %s153_s5 = inlined_call_operand.hbm [shape: f32[1,1], index: 5, kind: output, shape index: {1}]  }
   0x1   :  { %v11_v0 = vstv %s150_s2 }
   0x2   :  { %12 = vst [vmem:[#allocation2] sm:$0x1] %v11_v0 }
   0x3   :  { %v22_v1 = vld [vmem:[%s148_s0] sm:$0xff]  ;;  %vm30_vm0 = vcmask 261120  }
   0x4   :  { %v84_v2 = vld [vmem:[%s149_s1] ss:$0 sm:$0xff] }
   0x9   :  { %v24_v3 = vld [vmem:[#allocation2] sm:$0x1] }
   0xa   :  { %13 = vsyncpa [#allocation4], 0  ;;  %v29_v4 = vmul.f32 %v84_v2, %v22_v1  ;;  %79 = vpush %v24_v3  ;;  %v38_v7 = vld [vmem:[%s151_s3] sm:$0xff]  ;;  %vm36_vm1 = vcmask 7168   ;;  %s67_s27 = sshll.u32 %s153_s5, 4  ;;  %s99_s29 = smov [#allocation3]   ;;  %s68_s27 = int_to_ptr.hbm [resolvable:$true] %s67_s27 }
   0xc   :  { %v31_v5 = vsel %vm30_vm0, %v29_v4, 0.0 }
   0xd   :  { %32 = vadd.xlane.f32.xlu0 %v31_v5 }
  0x3b   :  { %s80_s24 = spop %79 }
  0x3c   :  { %v34_v6 = vstv %s80_s24 }
  0x80   :  { %v33_v8 = vpop.xlane.xlu0 %32 }
  0x81   :  { %v35_v9 = vadd.f32 %v34_v6, %v33_v8 }
  0x83   :  { %v39_v10 = vsub.f32 %v35_v9, %v38_v7  ;;  %37 = vst.msk [vmem:[%s152_s4] sm:$0xff] %vm36_vm1, %v35_v9 }
  0x85   :  { %v46_v11 = vmul.f32 %v39_v10, %v39_v10 }
  0x87   :  { %v48_v12 = vsel %vm36_vm1, %v46_v11, 0.0 }
  0x88   :  { %49 = vadd.xlane.f32.xlu0 %v48_v12 }
  0xfb   :  { %v50_v13 = vpop.xlane.xlu0 %49 }
  0xfc   :  { %v51_v14 = vrot.slane %v50_v13, 4 }
  0xfe   :  { %v52_v15 = vadd.f32 %v51_v14, %v50_v13 }
 0x100   :  { %v53_v16 = vrot.slane %v52_v15, 2 }
 0x102   :  { %v54_v17 = vadd.f32 %v53_v16, %v52_v15 }
 0x104   :  { %v55_v18 = vrot.slane %v54_v17, 1 }
 0x106   :  { %v56_v19 = vadd.f32 %v55_v18, %v54_v17 }
 0x108   :  { %81 = vpush %v56_v19 }
 0x139   :  { %s82_s28 = spop %81 }
 0x13a   :  { %59 = sst [smem:[#allocation3]] %s82_s28 }
 0x13b   :  { %70 = dma.smem_to_hbm %s99_s29, 16, %s68_s27, [#allocation4]  }
 0x13c   :  { %97 = dma.done.wait [#allocation4], 16  }
 0x13d   :  { %98 = vsyncadd [#allocation4], 4294967280 }
 0x13e   :  { %77 = sfence }
 0x13f   :  { %78 = vsyncpa [#allocation4], 1 }

</bundles_post_ra>
